<compile_context>
chip_gen: v7x
topology: tpu7x:2x2x1
jax: 0.10.0
libtpu: 0.0.40
codegen_flags: <defaults>
</compile_context>

<pallas_src>
import functools

import jax
import jax.numpy as jnp
from jax.experimental import pallas as pl
from jax.experimental.pallas import tpu as pltpu

_LANE = 128     # TPU lane width
_TM_CAP = 2048  # max token rows per grid step (footprint ~2 MiB at this size)


def _round_up(x, m):
    return ((x + m - 1) // m) * m


def _choose_tm(n):
    """Pick a tile size (multiple of 8, <= cap) that divides n when possible
    so no post-kernel row slice (an extra HBM pass) is needed."""
    if n <= _TM_CAP:
        return _round_up(n, 8)
    for tm in (2048, 1024, 512, 256, 128):
        if tm <= _TM_CAP and n % tm == 0:
            return tm
    return _TM_CAP  # falls back to row padding + a small post-kernel slice


def _gather_logits(idx_ref, table_ref):
    """Embedding row gather as a one-hot matmul on the MXU.

    Returns (tm, Vp) f32 logits plus the selection mask and lane iota for
    reuse by the loss math.
    """
    idx_row = idx_ref[...]                                   # (1, tm), lane-dense
    idx_col = jnp.transpose(idx_row, (1, 0))                 # (tm, 1) via XLU
    tm = idx_col.shape[0]
    vp = table_ref.shape[1]
    col = jax.lax.broadcasted_iota(jnp.int32, (tm, vp), 1)   # hoisted lane iota
    sel = col == idx_col                                     # (tm, Vp) one-hot mask
    onehot = sel.astype(jnp.float32)
    # Precision pinned: exact f32 row selection (0/1 contraction operand).
    logits = jnp.dot(onehot, table_ref[...],
                     preferred_element_type=jnp.float32,
                     precision=jax.lax.Precision.HIGHEST)
    return logits, sel, col


def _bigram_logits_kernel(idx_ref, table_ref, logits_ref):
    """Inference path: embedding gather only (no loss math)."""
    logits, _, _ = _gather_logits(idx_ref, table_ref)
    v = logits_ref.shape[1]
    logits_ref[...] = logits[:, :v]


def _bigram_loss_kernel(n_valid, idx_ref, tgt_ref, table_ref, lse_ref,
                        logits_ref, loss_ref):
    """Training path: gather + per-tile partial cross-entropy sum."""
    i = pl.program_id(0)
    logits, sel, col = _gather_logits(idx_ref, table_ref)
    tm = logits.shape[0]
    v = logits_ref.shape[1]
    logits_ref[...] = logits[:, :v]

    # Per-token lse = lse_table[idx]: masked select on the precomputed row,
    # reusing the one-hot compare.  No exp/log in the kernel.
    lse_tok = jnp.sum(jnp.where(sel, lse_ref[...], 0.0), axis=-1, keepdims=True)

    tgt_col = jnp.transpose(tgt_ref[...], (1, 0))            # (tm, 1)
    tgt_logit = jnp.sum(jnp.where(col == tgt_col, logits, 0.0),
                        axis=-1, keepdims=True)

    # Mask rows past the real N (padding rows added by the wrapper).
    rows = i * tm + jax.lax.broadcasted_iota(jnp.int32, (tm, 1), 0)
    valid = rows < n_valid
    partial = jnp.sum(jnp.where(valid, lse_tok - tgt_logit, 0.0))
    loss_ref[...] = jnp.broadcast_to(partial, (1, 1, _LANE))  # distinct per tile


def bigram_forward(table, idx, targets=None):
    """Mirrors BigramLanguageModel.forward.

    table:   (V, V) float32 embedding table
    idx:     (B, T) int32 token ids
    targets: (B, T) int32 token ids or None
    Returns (logits, loss). With targets: logits is (B*T, V), loss is a scalar
    (matching the PyTorch .view()); without: logits is (B, T, V), loss None.
    """
    # TODO(synk): generate() (autoregressive torch.multinomial sampling loop)
    # is host-side control flow around this forward; not a kernel.
    b, t = idx.shape
    v = table.shape[0]
    n = b * t
    vp = _round_up(max(v, _LANE), _LANE)
    tm = _choose_tm(n)
    n_pad = _round_up(n, tm)
    grid = (n_pad // tm,)

    # Zero padding is safe: padded vocab rows/cols are never selected by a
    # one-hot built from ids < V, and lse is computed from the unpadded table.
    table_p = jnp.pad(table.astype(jnp.float32), ((0, vp - v), (0, vp - v)))
    idx_p = jnp.pad(idx.reshape(1, n).astype(jnp.int32), ((0, 0), (0, n_pad - n)))

    ids_spec = pl.BlockSpec((1, tm), lambda i: (0, i))        # lane-dense ids
    table_spec = pl.BlockSpec((vp, vp), lambda i: (0, 0))     # resident table
    logits_spec = pl.BlockSpec((tm, v), lambda i: (i, 0))     # full-V rows
    cparams = pltpu.CompilerParams(
        dimension_semantics=("parallel",),
        vmem_limit_bytes=32 * 1024 * 1024)

    if targets is None:
        logits_p = pl.pallas_call(
            _bigram_logits_kernel,
            out_shape=jax.ShapeDtypeStruct((n_pad, v), jnp.float32),
            grid=grid,
            in_specs=[ids_spec, table_spec],
            out_specs=logits_spec,
            compiler_params=cparams,
        )(idx_p, table_p)
        logits = logits_p if n_pad == n else logits_p[:n]
        return logits.reshape(b, t, v), None

    tgt_p = jnp.pad(targets.reshape(1, n).astype(jnp.int32),
                    ((0, 0), (0, n_pad - n)))
    # O(V^2) one-time logsumexp over table rows (replaces O(N*V) in-kernel).
    lse_table = jax.scipy.special.logsumexp(table.astype(jnp.float32), axis=-1)
    lse_p = jnp.pad(lse_table, (0, vp - v)).reshape(1, vp)

    logits_p, partials = pl.pallas_call(
        functools.partial(_bigram_loss_kernel, n),
        out_shape=(
            jax.ShapeDtypeStruct((n_pad, v), jnp.float32),
            jax.ShapeDtypeStruct((grid[0], 1, _LANE), jnp.float32),
        ),
        grid=grid,
        in_specs=[ids_spec, ids_spec, table_spec,
                  pl.BlockSpec((1, vp), lambda i: (0, 0))],   # resident lse row
        out_specs=(logits_spec,
                   pl.BlockSpec((1, 1, _LANE), lambda i: (i, 0, 0))),
        compiler_params=cparams,
    )(idx_p, tgt_p, table_p, lse_p)

    logits = logits_p if n_pad == n else logits_p[:n]
    loss = jnp.sum(partials[:, 0, 0]) / jnp.float32(n)
    return logits, loss


if __name__ == "__main__":
    key = jax.random.PRNGKey(0)
    k_table, k_idx, k_tgt = jax.random.split(key, 3)

    VOCAB = 65   # e.g. tiny-shakespeare character vocab
    B, T = 2, 8

    # nn.Embedding default init: N(0, 1)
    table = jax.random.normal(k_table, (VOCAB, VOCAB), dtype=jnp.float32)
    idx = jax.random.randint(k_idx, (B, T), 0, VOCAB, dtype=jnp.int32)
    targets = jax.random.randint(k_tgt, (B, T), 0, VOCAB, dtype=jnp.int32)

    # Path with targets (logits reshaped to (B*T, V), scalar loss).
    logits, loss = bigram_forward(table, idx, targets)
    jax.block_until_ready((logits, loss))

    # Path without targets (logits (B, T, V), loss None) — no loss math run.
    logits_nt, loss_nt = bigram_forward(table, idx, None)
    jax.block_until_ready(logits_nt)

    # Sanity check against a pure-JAX reference.
    ref_logits = table[idx.reshape(-1)]
    ref_lse = jax.scipy.special.logsumexp(ref_logits, axis=-1)
    ref_loss = jnp.mean(
        ref_lse - jnp.take_along_axis(
            ref_logits, targets.reshape(-1, 1), axis=-1)[:, 0])

    assert logits.shape == (B * T, VOCAB)
    assert logits_nt.shape == (B, T, VOCAB) and loss_nt is None
    assert jnp.allclose(logits, ref_logits, atol=1e-5)
    assert jnp.allclose(logits_nt.reshape(B * T, VOCAB), ref_logits, atol=1e-5)
    assert jnp.allclose(loss, ref_loss, atol=1e-5)

    print("KERNEL_OK")
</pallas_src>

<mosaic_0001>
module attributes {stable_mosaic.version = 11 : i64} {
  func.func @_bigram_loss_kernel(%arg0: i32, %arg1: memref<1x16xi32, #tpu.memory_space<vmem>>, %arg2: memref<1x16xi32, #tpu.memory_space<vmem>>, %arg3: memref<128x128xf32, #tpu.memory_space<vmem>>, %arg4: memref<1x128xf32, #tpu.memory_space<vmem>>, %arg5: memref<16x65xf32, #tpu.memory_space<vmem>>, %arg6: memref<1x1x128xf32, #tpu.memory_space<vmem>>) attributes {dimension_semantics = [#tpu.dimension_semantics<parallel>], iteration_bounds = array<i64: 1>, scalar_prefetch = 0 : i64, scratch_operands = 0 : i64, tpu.core_type = #tpu.core_type<tc>, window_params = [{transform_indices = @transform_0, window_bounds = array<i64: 1, 16>}, {transform_indices = @transform_1, window_bounds = array<i64: 1, 16>}, {pipeline_mode = #tpu.pipeline_mode<synchronous>, transform_indices = @transform_2, window_bounds = array<i64: 128, 128>}, {pipeline_mode = #tpu.pipeline_mode<synchronous>, transform_indices = @transform_3, window_bounds = array<i64: 1, 128>}, {transform_indices = @transform_4, window_bounds = array<i64: 16, 65>}, {transform_indices = @transform_5, window_bounds = array<i64: 1, 1, 128>}]} {
    %c0 = arith.constant 0 : index
    %c0_0 = arith.constant 0 : index
    %0 = vector.load %arg1[%c0, %c0_0] : memref<1x16xi32, #tpu.memory_space<vmem>>, vector<1x16xi32>
    %1 = tpu.transpose %0, [1, 0] : vector<1x16xi32> -> vector<16x1xi32>
    %2 = tpu.iota {dimensions = array<i32: 1>} : vector<16x128xi32>
    %3 = vector.broadcast %1 : vector<16x1xi32> to vector<16x128xi32>
    %4 = arith.cmpi eq, %2, %3 : vector<16x128xi32>
    %5 = arith.extui %4 : vector<16x128xi1> to vector<16x128xi32>
    %6 = arith.sitofp %5 : vector<16x128xi32> to vector<16x128xf32>
    %c0_1 = arith.constant 0 : index
    %c0_2 = arith.constant 0 : index
    %7 = vector.load %arg3[%c0_1, %c0_2] : memref<128x128xf32, #tpu.memory_space<vmem>>, vector<128x128xf32>
    %cst = arith.constant dense<0.000000e+00> : vector<16x128xf32>
    %8 = tpu.matmul %6, %7, %cst {dimension_numbers = #tpu.dot_dimension_numbers<[1], [0], [0], [1], [0, 0, 1, 1], [], []>, precision = #tpu.contract_precision<fp32>} : vector<16x128xf32>, vector<128x128xf32>, vector<16x128xf32> -> vector<16x128xf32>
    %9 = vector.extract_strided_slice %8 {offsets = [0, 0], sizes = [16, 65], strides = [1, 1]} : vector<16x128xf32> to vector<16x65xf32>
    %c0_3 = arith.constant 0 : index
    %c0_4 = arith.constant 0 : index
    %10 = vector.load %arg5[%c0_3, %c0_4] : memref<16x65xf32, #tpu.memory_space<vmem>>, vector<16x65xf32>
    tpu.vector_store %arg5[%c0_3, %c0_4], %9 {strides = array<i32>} : memref<16x65xf32, #tpu.memory_space<vmem>>, vector<16x65xf32>,
    %c0_5 = arith.constant 0 : index
    %c0_6 = arith.constant 0 : index
    %11 = vector.load %arg4[%c0_5, %c0_6] : memref<1x128xf32, #tpu.memory_space<vmem>>, vector<1x128xf32>
    %cst_7 = arith.constant 0.000000e+00 : f32
    %12 = vector.shape_cast %11 : vector<1x128xf32> to vector<1x128xf32>
    %13 = vector.broadcast %12 : vector<1x128xf32> to vector<16x128xf32>
    %14 = vector.broadcast %cst_7 : f32 to vector<16x128xf32>
    %15 = arith.select %4, %13, %14 : vector<16x128xi1>, vector<16x128xf32>
    %cst_8 = arith.constant dense<0.000000e+00> : vector<16xf32>
    %16 = vector.multi_reduction <add>, %15, %cst_8 [1] : vector<16x128xf32> to vector<16xf32>
    %17 = vector.shape_cast %16 : vector<16xf32> to vector<16x1xf32>
    %c0_9 = arith.constant 0 : index
    %c0_10 = arith.constant 0 : index
    %18 = vector.load %arg2[%c0_9, %c0_10] : memref<1x16xi32, #tpu.memory_space<vmem>>, vector<1x16xi32>
    %19 = tpu.transpose %18, [1, 0] : vector<1x16xi32> -> vector<16x1xi32>
    %20 = vector.broadcast %19 : vector<16x1xi32> to vector<16x128xi32>
    %21 = arith.cmpi eq, %2, %20 : vector<16x128xi32>
    %cst_11 = arith.constant 0.000000e+00 : f32
    %22 = vector.broadcast %cst_11 : f32 to vector<16x128xf32>
    %23 = arith.select %21, %8, %22 : vector<16x128xi1>, vector<16x128xf32>
    %cst_12 = arith.constant dense<0.000000e+00> : vector<16xf32>
    %24 = vector.multi_reduction <add>, %23, %cst_12 [1] : vector<16x128xf32> to vector<16xf32>
    %25 = vector.shape_cast %24 : vector<16xf32> to vector<16x1xf32>
    %c16_i32 = arith.constant 16 : i32
    %26 = arith.muli %arg0, %c16_i32 : i32
    %27 = tpu.iota {dimensions = array<i32: 0>} : vector<16x1xi32>
    %28 = vector.broadcast %26 : i32 to vector<16x1xi32>
    %29 = arith.addi %28, %27 : vector<16x1xi32>
    %c16_i32_13 = arith.constant 16 : i32
    %30 = vector.broadcast %c16_i32_13 : i32 to vector<16x1xi32>
    %31 = arith.cmpi slt, %29, %30 : vector<16x1xi32>
    %32 = arith.subf %17, %25 : vector<16x1xf32>
    %cst_14 = arith.constant 0.000000e+00 : f32
    %33 = vector.broadcast %cst_14 : f32 to vector<16x1xf32>
    %34 = arith.select %31, %32, %33 : vector<16x1xi1>, vector<16x1xf32>
    %35 = vector.shape_cast %34 : vector<16x1xf32> to vector<1x16x1xf32>
    %cst_15 = arith.constant dense<0.000000e+00> : vector<1xf32>
    %36 = vector.multi_reduction <add>, %35, %cst_15 [1, 2] : vector<1x16x1xf32> to vector<1xf32>
    %37 = vector.shape_cast %36 : vector<1xf32> to vector<1x1x1xf32>
    %38 = vector.extract %37[0, 0, 0] : f32 from vector<1x1x1xf32>
    %39 = vector.broadcast %38 : f32 to vector<1x1x128xf32>
    %c0_16 = arith.constant 0 : index
    %c0_17 = arith.constant 0 : index
    %c0_18 = arith.constant 0 : index
    %40 = vector.load %arg6[%c0_16, %c0_17, %c0_18] : memref<1x1x128xf32, #tpu.memory_space<vmem>>, vector<1x1x128xf32>
    tpu.vector_store %arg6[%c0_16, %c0_17, %c0_18], %39 {strides = array<i32>} : memref<1x1x128xf32, #tpu.memory_space<vmem>>, vector<1x1x128xf32>,
    return
  }
  func.func @transform_0(%arg0: i32) -> (i32, i32) {
    %c0_i32 = arith.constant 0 : i32
    %c0_i32_0 = arith.constant 0 : i32
    return %c0_i32, %arg0 : i32, i32
  }
  func.func @transform_1(%arg0: i32) -> (i32, i32) {
    %c0_i32 = arith.constant 0 : i32
    %c0_i32_0 = arith.constant 0 : i32
    return %c0_i32, %arg0 : i32, i32
  }
  func.func @transform_2(%arg0: i32) -> (i32, i32) {
    %c0_i32 = arith.constant 0 : i32
    %c0_i32_0 = arith.constant 0 : i32
    %c0_i32_1 = arith.constant 0 : i32
    return %c0_i32, %c0_i32_0 : i32, i32
  }
  func.func @transform_3(%arg0: i32) -> (i32, i32) {
    %c0_i32 = arith.constant 0 : i32
    %c0_i32_0 = arith.constant 0 : i32
    %c0_i32_1 = arith.constant 0 : i32
    return %c0_i32, %c0_i32_0 : i32, i32
  }
  func.func @transform_4(%arg0: i32) -> (i32, i32) {
    %c0_i32 = arith.constant 0 : i32
    %c0_i32_0 = arith.constant 0 : i32
    return %arg0, %c0_i32 : i32, i32
  }
  func.func @transform_5(%arg0: i32) -> (i32, i32, i32) {
    %c0_i32 = arith.constant 0 : i32
    %c0_i32_0 = arith.constant 0 : i32
    %c0_i32_1 = arith.constant 0 : i32
    return %arg0, %c0_i32, %c0_i32_0 : i32, i32, i32
  }
}

</mosaic_0001>

<bundles_post_ra>
// kernel: tpu_custom_call.1
= control target key start
LH: loop header
LB: loop body
LE: loop exit
PB: predicated region body
PF: predicated region fallthrough
CT: control target
= control target key end

     0   :  { %11 = vsyncpa [#allocation3], 0  ;;  %s1957_s0 = inlined_call_operand.hbm [shape: s32[1,16], index: 0, kind: input, shape index: {}]   ;;  %s1958_s1 = inlined_call_operand.vmem [shape: s32[1,16], index: 1, kind: input, shape index: {}]   ;;  %s1959_s2 = inlined_call_operand.hbm [shape: f32[128,128], index: 2, kind: input, shape index: {}]   ;;  %s1960_s3 = inlined_call_operand.vmem [shape: f32[1,128], index: 3, kind: input, shape index: {}]   ;;  %s1961_s4 = inlined_call_operand.hbm [shape: f32[16,65], index: 4, kind: output, shape index: {0}]   ;;  %s1962_s5 = inlined_call_operand.hbm [shape: f32[1,1,128], index: 5, kind: output, shape index: {1}]  }
   0x1   :  { %12 = vsyncpa [#allocation6], 0 }
   0x2   :  { %13 = vsyncpa [#allocation4], 0 }
   0x3   :  { %14 = vsyncpa [#allocation9], 0  ;;  %s1555_s18 = smov [#allocation2]   ;;  %s1556_s20 = smov [#allocation5]  }
   0x4   :  { %s21_s19 = sshll.u32 %s1555_s18, 4  ;;  %s32_s21 = sshll.u32 %s1556_s20, 4  ;;  %s22_s19 = int_to_ptr.vmem [resolvable:$true] %s21_s19  ;;  %s1594_s21 = int_to_ptr.vmem [resolvable:$true] %s32_s21 }
   0x5   :  { %s1459_s24 = scalar_lea.hbm %s1957_s0, 16 }
   0x6   :  { %p1460_p0 = scmp.ne.s32.totalorder %s1957_s0, %s1459_s24  ;;  %p1463_p1 = scmp.lt.u32.totalorder %s1459_s24, %s1957_s0 }
   0x8   :  { %p1465_p2 = pnand %p1463_p1, %p1460_p0 }
   0xa   :  { %1468 = shalt.err (!%p1465_p2)
}
   0xb   :  { %s1469_s29 = scalar_lea.vmem %s22_s19, 16  ;;  %s1473_s30 = scalar_lea.vmem %s22_s19, 32 }
   0xc   :  { %p1470_p3 = scmp.ne.s32.totalorder %s22_s19, %s1469_s29  ;;  %p1474_p4 = scmp.lt.s32.totalorder %s22_s19, %s22_s19 }
   0xd   :  { %p1475_p5 = scmp.lt.s32.totalorder %s1473_s30, %s1469_s29 }
   0xf   :  { %p1476_p6 = por %p1475_p5, %p1474_p4 }
  0x11   :  { %p1477_p7 = pnand %p1476_p6, %p1470_p3 }
  0x13   :  { %1480 = shalt.err (!%p1477_p7)
}
  0x14   :  { %24 = dma.hbm_to_vmem [thread:$0]  %s1957_s0, 16, %s22_s19, [#allocation3]  }
  0x15   :  { %s1481_s10 = scalar_lea.hbm %s1959_s2, 2048 }
  0x16   :  { %p1482_p8 = scmp.ne.s32.totalorder %s1959_s2, %s1481_s10  ;;  %p1485_p9 = scmp.lt.u32.totalorder %s1481_s10, %s1959_s2 }
  0x18   :  { %p1487_p10 = pnand %p1485_p9, %p1482_p8 }
  0x1a   :  { %1490 = shalt.err (!%p1487_p10)
}
  0x1b   :  { %s1491_s15 = scalar_lea.vmem %s1594_s21, 2048  ;;  %p1496_p12 = scmp.lt.s32.totalorder %s1594_s21, %s1594_s21 }
  0x1c   :  { %p1492_p11 = scmp.ne.s32.totalorder %s1594_s21, %s1491_s15  ;;  %p1497_p13 = scmp.lt.s32.totalorder %s1491_s15, %s1491_s15 }
  0x1e   :  { %p1498_p0 = por %p1497_p13, %p1496_p12 }
  0x20   :  { %p1499_p1 = pnand %p1498_p0, %p1492_p11 }
  0x22   :  { %1502 = shalt.err (!%p1499_p1)
}
  0x23   :  { %s1557_s0 = smov 128   ;;  %s1558_s16 = smov 8  }
  0x24   :  { %38 = dma.hbm_to_vmem [thread:$0]  %s1959_s2, 2048, %s1594_s21, [#allocation6], %s1557_s0, %s1557_s0, %s1558_s16  }
  0x25   :  { %1547 = dma.done.wait [#allocation3], 16  }
  0x26   :  { %1548 = vsyncadd [#allocation3], 4294967280 }
  0x27   :  { %1549 = dma.done.wait [#allocation6], 2048  }
  0x28   :  { %1550 = vsyncadd [#allocation6], 4294965248  ;;  %v1559_v0 = vmov 0   ;;  %v47_v1 = vld [vmem:[#allocation2] sm:$0x1]  ;;  %v1628_v2 = vld [vmem:[#allocation5] sm:$0xff] }
  0x29   :  { %1458 = vset.pattern.permute.xlu1 %v1559_v0  ;;  %48 = vxpose.xlu0.b32.start.end [1/1] (short) (narrow) %v47_v1, 16  ;;  %v1630_v3 = vld [vmem:[#allocation5 + $0x8] sm:$0xff]  ;;  %v1632_v4 = vld [vmem:[#allocation5 + $0x10] sm:$0xff]  ;;  %v111_v5 = vand.u32 4294901760, %v1628_v2  ;;  %v1636_v7 = vld [vmem:[#allocation5 + $0x18] sm:$0xff]  ;;  %vm794_vm2 = vcmask 531456  }
  0x2a   :  { %v114_v6 = vand.u32 4294901760, %v1630_v3  ;;  %v117_v8 = vand.u32 4294901760, %v1632_v4  ;;  %v1639_v9 = vld [vmem:[#allocation5 + $0x20] sm:$0xff]  ;;  %v1641_v10 = vld [vmem:[#allocation5 + $0x28] sm:$0xff]  ;;  %v120_v11 = vand.u32 4294901760, %v1636_v7  ;;  %v1658_v16 = vld [vmem:[#allocation5 + $0x30] sm:$0xff] }
  0x2b   :  { %v123_v13 = vand.u32 4294901760, %v1639_v9  ;;  %v126_v14 = vand.u32 4294901760, %v1641_v10  ;;  %v1660_v17 = vld [vmem:[#allocation5 + $0x38] sm:$0xff]  ;;  %v129_v19 = vand.u32 4294901760, %v1658_v16  ;;  %v1676_v21 = vld [vmem:[#allocation5 + $0x40] sm:$0xff]  ;;  %v1678_v22 = vld [vmem:[#allocation5 + $0x48] sm:$0xff]  ;;  %v213_v44 = vsub.f32 %v1628_v2, %v111_v5 }
  0x2c   :  { %v1648_v12 = vpack.c.bf16 %v114_v6, %v111_v5  ;;  %v1656_v15 = vpack.c.bf16 %v120_v11, %v117_v8  ;;  %v132_v20 = vand.u32 4294901760, %v1660_v17  ;;  %v135_v24 = vand.u32 4294901760, %v1676_v21  ;;  %v1692_v26 = vld [vmem:[#allocation5 + $0x50] sm:$0xff]  ;;  %v1694_v27 = vld [vmem:[#allocation5 + $0x58] sm:$0xff]  ;;  %v106_v32 = vld [vmem:[#allocation5 + $0x60] sm:$0xff] }
  0x2d   :  { %v1672_v18 = vpack.c.bf16 %v126_v14, %v123_v13  ;;  %v138_v25 = vand.u32 4294901760, %v1678_v22  ;;  %v141_v29 = vand.u32 4294901760, %v1692_v26  ;;  %v144_v30 = vand.u32 4294901760, %v1694_v27  ;;  %v107_v33 = vld [vmem:[#allocation5 + $0x68] sm:$0xff]  ;;  %v108_v38 = vld [vmem:[#allocation5 + $0x70] sm:$0xff]  ;;  %v109_v39 = vld [vmem:[#allocation5 + $0x78] sm:$0xff] }
  0x2e   :  { %1341 = vmatprep.subr.bf16.mxu0 %v1648_v12  ;;  %1245 = vmatprep.subr.bf16.mxu1 %v1648_v12  ;;  %v1688_v23 = vpack.c.bf16 %v132_v20, %v129_v19  ;;  %v147_v34 = vand.u32 4294901760, %v106_v32  ;;  %v150_v35 = vand.u32 4294901760, %v107_v33  ;;  %v153_v40 = vand.u32 4294901760, %v108_v38 }
  0x2f   :  { %1343 = vmatpush3.bf16.msra.mxu0 %v1648_v12  ;;  %1247 = vmatpush3.bf16.msra.mxu1 %v1648_v12  ;;  %v1704_v28 = vpack.c.bf16 %v138_v25, %v135_v24  ;;  %v1716_v31 = vpack.c.bf16 %v144_v30, %v141_v29  ;;  %v156_v41 = vand.u32 4294901760, %v109_v39  ;;  %v220_v45 = vsub.f32 %v1630_v3, %v114_v6 }
  0x30   :  { %1345 = vmatprep.subr.bf16.mxu0 %v1656_v15  ;;  %1249 = vmatprep.subr.bf16.mxu1 %v1656_v15  ;;  %v1724_v37 = vpack.c.bf16 %v150_v35, %v147_v34  ;;  %v214_v46 = vand.u32 4294901760, %v213_v44  ;;  %v297_v54 = vsub.f32 %v106_v32, %v147_v34  ;;  %v304_v55 = vsub.f32 %v107_v33, %v150_v35  ;;  %v810_v35 = vld [vmem:[%s1958_s1] sm:$0x1] }
  0x31   :  { %v1730_v43 = vpack.c.bf16 %v156_v41, %v153_v40  ;;  %v221_v47 = vand.u32 4294901760, %v220_v45  ;;  %v311_v59 = vsub.f32 %v108_v38, %v153_v40  ;;  %v318_v60 = vsub.f32 %v109_v39, %v156_v41 }
  0x32   :  { %v215_v49 = vsub.f32 %v213_v44, %v214_v46  ;;  %v298_v56 = vand.u32 4294901760, %v297_v54  ;;  %v305_v57 = vand.u32 4294901760, %v304_v55  ;;  %v1759_v38 = vpack.c.bf16 %v220_v45, %v213_v44 }
  0x33   :  { %1347 = vmatpush3.bf16.msra.mxu0 %v1656_v15  ;;  %1251 = vmatpush3.bf16.msra.mxu1 %v1656_v15  ;;  %v1742_v48 = vpack.c.bf16 %v221_v47, %v214_v46  ;;  %v222_v50 = vsub.f32 %v220_v45, %v221_v47  ;;  %v319_v1 = vand.u32 4294901760, %v318_v60  ;;  %v1761_v39 = vpack.c.bf16 %v304_v55, %v297_v54 }
  0x34   :  { %1349 = vmatprep.subr.bf16.mxu0 %v1672_v18  ;;  %1253 = vmatprep.subr.bf16.mxu1 %v1672_v18  ;;  %v216_v51 = vand.u32 4294901760, %v215_v49  ;;  %v299_v58 = vsub.f32 %v297_v54, %v298_v56  ;;  %v1748_v61 = vpack.c.bf16 %v305_v57, %v298_v56  ;;  %v306_v62 = vsub.f32 %v304_v55, %v305_v57 }
  0x35   :  { %v223_v52 = vand.u32 4294901760, %v222_v50  ;;  %v320_v6 = vsub.f32 %v318_v60, %v319_v1  ;;  %v1763_v40 = vpack.c.bf16 %v318_v60, %v311_v59  ;;  %v80_v41 = vlaneseq }
  0x36   :  { %v300_v63 = vand.u32 4294901760, %v299_v58  ;;  %v307_v2 = vand.u32 4294901760, %v306_v62  ;;  %v1773_v46 = vsub.f32 %v1636_v7, %v120_v11  ;;  %v1782_v49 = vsub.f32 %v1639_v9, %v123_v13 }
  0x37   :  { %1351 = vmatpush3.bf16.msra.mxu0 %v1672_v18  ;;  %1255 = vmatpush3.bf16.msra.mxu1 %v1672_v18  ;;  %v1745_v53 = vpack.c.bf16 %v223_v52, %v216_v51  ;;  %v321_v33 = vand.u32 4294901760, %v320_v6  ;;  %v1775_v47 = vand.u32 127, %v80_v41  ;;  %v1810_v55 = vsub.f32 %v1660_v17, %v132_v20 }
  0x38   :  { %1353 = vmatprep.subr.bf16.mxu0 %v1688_v23  ;;  %1257 = vmatprep.subr.bf16.mxu1 %v1688_v23  ;;  %v235_v45 = vand.u32 4294901760, %v1773_v46  ;;  %v242_v13 = vand.u32 4294901760, %v1782_v49  ;;  %v1836_v6 = vsub.f32 %v1678_v22, %v138_v25  ;;  %v1561_v41 = vmov 1.0  }
  0x39   :  { %vm870_vm5 = vcmask 7168  }
  0x3a   :  { %v236_v9 = vsub.f32 %v1773_v46, %v235_v45  ;;  %v243_v17 = vsub.f32 %v1782_v49, %v242_v13 }
  0x3b   :  { %1355 = vmatpush3.bf16.msra.mxu0 %v1688_v23  ;;  %1259 = vmatpush3.bf16.msra.mxu1 %v1688_v23 }
  0x3c   :  { %1357 = vmatprep.subr.bf16.mxu0 %v1704_v28  ;;  %1261 = vmatprep.subr.bf16.mxu1 %v1704_v28 }
  0x3f   :  { %1359 = vmatpush3.bf16.msra.mxu0 %v1704_v28  ;;  %1263 = vmatpush3.bf16.msra.mxu1 %v1704_v28 }
  0x40   :  { %1361 = vmatprep.subr.bf16.mxu0 %v1716_v31  ;;  %1265 = vmatprep.subr.bf16.mxu1 %v1716_v31 }
  0x43   :  { %1363 = vmatpush3.bf16.msra.mxu0 %v1716_v31  ;;  %1267 = vmatpush3.bf16.msra.mxu1 %v1716_v31 }
  0x44   :  { %1365 = vmatprep.subr.bf16.mxu0 %v1724_v37  ;;  %1269 = vmatprep.subr.bf16.mxu1 %v1724_v37 }
  0x47   :  { %1367 = vmatpush3.bf16.msra.mxu0 %v1724_v37  ;;  %1271 = vmatpush3.bf16.msra.mxu1 %v1724_v37 }
  0x48   :  { %1369 = vmatprep.subr.bf16.mxu0 %v1730_v43  ;;  %1273 = vmatprep.subr.bf16.mxu1 %v1730_v43 }
  0x4b   :  { %1371 = vmatpush3.bf16.msra.mxu0 %v1730_v43  ;;  %1275 = vmatpush3.bf16.msra.mxu1 %v1730_v43 }
  0x4c   :  { %1373 = vmatprep.subr.bf16.mxu0 %v1742_v48  ;;  %1277 = vmatprep.subr.bf16.mxu1 %v1745_v53 }
  0x52   :  { %1457 = vset.pattern.permute.xlu0 %v1559_v0  ;;  %v312_v0 = vand.u32 4294901760, %v311_v59 }
  0x54   :  { %v1750_v3 = vpack.c.bf16 %v319_v1, %v312_v0  ;;  %v313_v5 = vsub.f32 %v311_v59, %v312_v0  ;;  %v1830_v0 = vsub.f32 %v1676_v21, %v135_v24 }
  0x56   :  { %v314_v32 = vand.u32 4294901760, %v313_v5  ;;  %v270_v22 = vand.u32 4294901760, %v1830_v0 }
  0x58   :  { %v1754_v34 = vpack.c.bf16 %v321_v33, %v314_v32 }
  0xa9   :  { %v64_v36 = vpop.trf.xlu0 }
  0xaa   :  { %83 = vperm.xlu0 %1457, %v64_v36   ;;  %v1752_v36 = vpack.c.bf16 %v307_v2, %v300_v63  ;;  %v263_v63 = vand.u32 4294901760, %v1810_v55 }
  0xad   :  { %v65_v42 = vpop.trf.xlu0 }
  0xae   :  { %86 = vperm.xlu1 %1458, %v65_v42   ;;  %v1768_v42 = vsub.f32 %v1632_v4, %v117_v8  ;;  %v1787_v4 = vsub.f32 %v1641_v10, %v126_v14  ;;  %v1560_v8 = vmov 0.0   ;;  %v1805_v14 = vsub.f32 %v1658_v16, %v129_v19 }
  0xaf   :  { %v237_v19 = vand.u32 4294901760, %v236_v9 }
  0xb0   :  { %v228_v44 = vand.u32 4294901760, %v1768_v42  ;;  %v249_v10 = vand.u32 4294901760, %v1787_v4  ;;  %v256_v62 = vand.u32 4294901760, %v1805_v14 }
  0xb2   :  { %v229_v51 = vsub.f32 %v1768_v42, %v228_v44  ;;  %v250_v20 = vsub.f32 %v1787_v4, %v249_v10  ;;  %v1376_v5 = vpack.c.bf16 %v235_v45, %v228_v44  ;;  %v257_v24 = vsub.f32 %v1805_v14, %v256_v62 }
  0xb3   :  { %v264_v44 = vsub.f32 %v1810_v55, %v263_v63  ;;  %v277_v45 = vand.u32 4294901760, %v1836_v6 }
  0xb4   :  { %v230_v59 = vand.u32 4294901760, %v229_v51  ;;  %v251_v21 = vand.u32 4294901760, %v250_v20  ;;  %v1384_v51 = vpack.c.bf16 %v263_v63, %v256_v62  ;;  %v258_v9 = vand.u32 4294901760, %v257_v24 }
  0xb6   :  { %v1280_v33 = vpack.c.bf16 %v237_v19, %v230_v59 }
  0xd7   :  { %811 = vxpose.xlu1.b32.start.end [1/1] (short) (narrow) %v810_v35, 16  ;;  %v244_v35 = vand.u32 4294901760, %v243_v17 }
 0x129   :  { %v84_v50 = vpop.permute.xlu0 %83 }
 0x12a   :  { %vm1790_vm0 = vcmp.eq.s32.totalorder %v1775_v47, %v84_v50  ;;  %v1855_v50 = vsub.f32 %v1694_v27, %v144_v30 }
 0x12b   :  { %v917_v11 = vsel %vm1790_vm0, 1.0, %v1560_v8 }
 0x12c   :  { %v1797_v52 = vsub.f32 %v917_v11, %v917_v11  ;;  %v1284_v11 = vpack.c.bf16 %v251_v21, %v244_v35  ;;  %v291_v30 = vand.u32 4294901760, %v1855_v50 }
 0x12d   :  { %v87_v54 = vpop.permute.xlu1 %86 }
 0x12e   :  { %vm1813_vm1 = vcmp.eq.s32.totalorder %v1775_v47, %v87_v54  ;;  %v193_v57 = vand.u32 4294901760, %v1797_v52  ;;  %v265_v54 = vand.u32 4294901760, %v264_v44  ;;  %v292_v59 = vsub.f32 %v1855_v50, %v291_v30 }
 0x12f   :  { %v918_v58 = vsel %vm1813_vm1, 1.0, %v1560_v8  ;;  %v1380_v8 = vpack.c.bf16 %v249_v10, %v242_v13  ;;  %v1388_v13 = vpack.c.bf16 %v277_v45, %v270_v22 }
 0x130   :  { %v1820_v60 = vsub.f32 %v918_v58, %v918_v58  ;;  %1171 = vmatprep.mubr.f32.mxu0 %v193_v57  ;;  %v194_v16 = vsub.f32 %v1797_v52, %v193_v57  ;;  %v293_v20 = vand.u32 4294901760, %v292_v59 }
 0x132   :  { %v195_v1 = vand.u32 4294901760, %v194_v16  ;;  %v203_v2 = vand.u32 4294901760, %v1820_v60 }
 0x134   :  { %1066 = vmatprep.mubr.f32.mxu1 %v195_v1  ;;  %1172 = vmatmul.mubr.f32.vlgmr.msra.gmra.mrb[0].mxu0 %v203_v2  ;;  %v204_v32 = vsub.f32 %v1820_v60, %v203_v2 }
 0x135   :  { %1375 = vmatpush3.bf16.msra.mxu0 %v1742_v48  ;;  %1206 = vmatprep.mubr.msk.f32.mxu0 %vm1790_vm0, %v1561_v41  ;;  %v1850_v48 = vsub.f32 %v1692_v26, %v141_v29  ;;  %v271_v26 = vsub.f32 %v1830_v0, %v270_v22  ;;  %v278_v29 = vsub.f32 %v1836_v6, %v277_v45 }
 0x136   :  { %1377 = vmatprep.subr.bf16.mxu0 %v1376_v5  ;;  %v205_v25 = vand.u32 4294901760, %v204_v32 }
 0x137   :  { %v284_v27 = vand.u32 4294901760, %v1850_v48  ;;  %v272_v10 = vand.u32 4294901760, %v271_v26  ;;  %v279_v57 = vand.u32 4294901760, %v278_v29 }
 0x138   :  { %1067 = vmatmul.mubr.f32.vlgmr.msra.gmra.mrb[0].mxu1 %v205_v25 }
 0x139   :  { %1279 = vmatpush3.bf16.msra.mxu1 %v1745_v53  ;;  %1379 = vmatpush3.bf16.msra.mxu0 %v1376_v5  ;;  %v1288_v53 = vpack.c.bf16 %v265_v54, %v258_v9  ;;  %v285_v58 = vsub.f32 %v1850_v48, %v284_v27  ;;  %v1292_v16 = vpack.c.bf16 %v279_v57, %v272_v10 }
 0x13a   :  { %1101 = vmatprep.mubr.msk.f32.mxu1 %vm1790_vm0, %v1561_v41  ;;  %1281 = vmatprep.subr.bf16.mxu1 %v1280_v33  ;;  %v1392_v19 = vpack.c.bf16 %v291_v30, %v284_v27 }
 0x13b   :  { %1381 = vmatprep.subr.bf16.mxu0 %v1380_v8  ;;  %v286_v17 = vand.u32 4294901760, %v285_v58 }
 0x13d   :  { %1283 = vmatpush3.bf16.msra.mxu1 %v1280_v33  ;;  %1383 = vmatpush3.bf16.msra.mxu0 %v1380_v8  ;;  %v1296_v62 = vpack.c.bf16 %v293_v20, %v286_v17 }
 0x13e   :  { %1285 = vmatprep.subr.bf16.mxu1 %v1284_v11  ;;  %1385 = vmatprep.subr.bf16.mxu0 %v1384_v51 }
 0x141   :  { %1287 = vmatpush3.bf16.msra.mxu1 %v1284_v11  ;;  %1387 = vmatpush3.bf16.msra.mxu0 %v1384_v51 }
 0x142   :  { %1289 = vmatprep.subr.bf16.mxu1 %v1288_v53  ;;  %1389 = vmatprep.subr.bf16.mxu0 %v1388_v13 }
 0x145   :  { %1291 = vmatpush3.bf16.msra.mxu1 %v1288_v53  ;;  %1391 = vmatpush3.bf16.msra.mxu0 %v1388_v13 }
 0x146   :  { %1293 = vmatprep.subr.bf16.mxu1 %v1292_v16  ;;  %1393 = vmatprep.subr.bf16.mxu0 %v1392_v19 }
 0x149   :  { %1295 = vmatpush3.bf16.msra.mxu1 %v1292_v16  ;;  %1395 = vmatpush3.bf16.msra.mxu0 %v1392_v19 }
 0x14a   :  { %1297 = vmatprep.subr.bf16.mxu1 %v1296_v62  ;;  %1397 = vmatprep.subr.bf16.mxu0 %v1748_v61 }
 0x14d   :  { %1299 = vmatpush3.bf16.msra.mxu1 %v1296_v62  ;;  %1399 = vmatpush3.bf16.msra.mxu0 %v1748_v61  ;;  %v1312_v61 = vpack.c.bf16 %v1773_v46, %v1768_v42 }
 0x14e   :  { %1301 = vmatprep.subr.bf16.mxu1 %v1752_v36  ;;  %1401 = vmatprep.subr.bf16.mxu0 %v1750_v3 }
 0x151   :  { %1303 = vmatpush3.bf16.msra.mxu1 %v1752_v36  ;;  %1403 = vmatpush3.bf16.msra.mxu0 %v1750_v3 }
 0x152   :  { %1305 = vmatprep.subr.bf16.mxu1 %v1754_v34  ;;  %1405 = vmatprep.subr.bf16.mxu0 %v1648_v12 }
 0x154   :  { %1207 = vmatmul.mubr.msk.f32.vlgmr.msra.gmra.mrb[0].mxu0 %vm1813_vm1, %v1561_v41 }
 0x155   :  { %1307 = vmatpush3.bf16.msra.mxu1 %v1754_v34  ;;  %1407 = vmatpush3.bf16.msra.mxu0 %v1648_v12  ;;  %v1316_v12 = vpack.c.bf16 %v1787_v4, %v1782_v49  ;;  %v1320_v34 = vpack.c.bf16 %v1810_v55, %v1805_v14 }
 0x156   :  { %1241 = vmatprep.mubr.msk.f32.mxu0 %vm1790_vm0, %v1561_v41  ;;  %1309 = vmatprep.subr.bf16.mxu1 %v1759_v38 }
 0x157   :  { %v827_v3 = vpop.trf.xlu1  ;;  %1409 = vmatprep.subr.bf16.mxu0 %v1656_v15 }
 0x158   :  { %1102 = vmatmul.mubr.msk.f32.vlgmr.msra.gmra.mrb[0].mxu1 %vm1813_vm1, %v1561_v41  ;;  %844 = vperm.xlu1 %1458, %v827_v3  }
 0x159   :  { %1311 = vmatpush3.bf16.msra.mxu1 %v1759_v38  ;;  %1136 = vmatprep.mubr.f32.mxu1 %v1797_v52 }
 0x15a   :  { %1411 = vmatpush3.bf16.msra.mxu0 %v1656_v15  ;;  %1313 = vmatprep.subr.bf16.mxu1 %v1312_v61  ;;  %v1324_v15 = vpack.c.bf16 %v1836_v6, %v1830_v0 }
 0x15b   :  { %v828_v36 = vpop.trf.xlu1  ;;  %1413 = vmatprep.subr.bf16.mxu0 %v1672_v18 }
 0x15c   :  { %847 = vperm.xlu0 %1457, %v828_v36  }
 0x15d   :  { %1315 = vmatpush3.bf16.msra.mxu1 %v1312_v61 }
 0x15e   :  { %1415 = vmatpush3.bf16.msra.mxu0 %v1672_v18  ;;  %1317 = vmatprep.subr.bf16.mxu1 %v1316_v12  ;;  %v1328_v18 = vpack.c.bf16 %v1855_v50, %v1850_v48 }
 0x15f   :  { %1417 = vmatprep.subr.bf16.mxu0 %v1688_v23 }
 0x161   :  { %1319 = vmatpush3.bf16.msra.mxu1 %v1316_v12 }
 0x162   :  { %1419 = vmatpush3.bf16.msra.mxu0 %v1688_v23  ;;  %1321 = vmatprep.subr.bf16.mxu1 %v1320_v34  ;;  %v925_v23 = vld [vmem:[%s1960_s3] ss:$0 sm:$0xff]  ;;  %s1562_s3 = smov [#allocation7]  }
 0x163   :  { %1421 = vmatprep.subr.bf16.mxu0 %v1704_v28  ;;  %s890_s21 = sshll.u32 %s1562_s3, 4  ;;  %s891_s21 = int_to_ptr.vmem [resolvable:$true] %s890_s21 }
 0x164   :  { %s1503_s22 = scalar_lea.vmem %s891_s21, 256  ;;  %p1508_p3 = scmp.lt.s32.totalorder %s891_s21, %s891_s21 }
 0x165   :  { %1323 = vmatpush3.bf16.msra.mxu1 %v1320_v34  ;;  %p1504_p2 = scmp.ne.s32.totalorder %s891_s21, %s1503_s22  ;;  %p1509_p4 = scmp.lt.s32.totalorder %s1503_s22, %s1503_s22 }
 0x166   :  { %1423 = vmatpush3.bf16.msra.mxu0 %v1704_v28  ;;  %1325 = vmatprep.subr.bf16.mxu1 %v1324_v15  ;;  %v804_v28 = vsel %vm1790_vm0, %v925_v23, 0.0 }
 0x167   :  { %1425 = vmatprep.subr.bf16.mxu0 %v1716_v31  ;;  %p1510_p5 = por %p1509_p4, %p1508_p3 }
 0x169   :  { %1327 = vmatpush3.bf16.msra.mxu1 %v1324_v15  ;;  %p1511_p6 = pnand %p1510_p5, %p1504_p2 }
 0x16a   :  { %1427 = vmatpush3.bf16.msra.mxu0 %v1716_v31  ;;  %1329 = vmatprep.subr.bf16.mxu1 %v1328_v18  ;;  %v805_v31 = vsel %vm1813_vm1, %v925_v23, 0.0 }
 0x16b   :  { %1429 = vmatprep.subr.bf16.mxu0 %v1724_v37 }
 0x16d   :  { %1331 = vmatpush3.bf16.msra.mxu1 %v1328_v18 }
 0x16e   :  { %1431 = vmatpush3.bf16.msra.mxu0 %v1724_v37  ;;  %1333 = vmatprep.subr.bf16.mxu1 %v1761_v39 }
 0x16f   :  { %1433 = vmatprep.subr.bf16.mxu0 %v1730_v43 }
 0x171   :  { %1335 = vmatpush3.bf16.msra.mxu1 %v1761_v39 }
 0x172   :  { %1435 = vmatpush3.bf16.msra.mxu0 %v1730_v43  ;;  %1337 = vmatprep.subr.bf16.mxu1 %v1763_v40 }
 0x175   :  { %1242 = vmatmul.mubr.msk.f32.vlgmr.msra.gmra.mrb[0].mxu0 %vm1813_vm1, %v1561_v41  ;;  %1339 = vmatpush3.bf16.msra.mxu1 %v1763_v40 }
 0x178   :  { %1137 = vmatmul.mubr.f32.vlgmr.msra.gmra.mrb[0].mxu1 %v1820_v60 }
 0x17b   :  { %806 = vadd.xlane.f32.xlu0 %v804_v28 }
 0x17c   :  { %808 = vadd.xlane.f32.xlu1 %v805_v31 }
 0x1d7   :  { %v845_v38 = vpop.permute.xlu1 %844 }
 0x1d8   :  { %vm849_vm3 = vcmp.eq.s32.totalorder %v1775_v47, %v845_v38 }
 0x1db   :  { %v848_v49 = vpop.permute.xlu0 %847 }
 0x1dc   :  { %vm850_vm4 = vcmp.eq.s32.totalorder %v1775_v47, %v848_v49 }
 0x208   :  { %v807_v52 = vpop.xlane.xlu0 %806 }
 0x209   :  { %v809_v56 = vpop.xlane.xlu1 %808 }
 0x248   :  { %v1243_v37 = vpop.f32.mrb[0].mxu0 }
 0x249   :  { %v784_v43 = vpop.f32.mrb[1].mxu0 }
 0x24b   :  { %v1138_v39 = vpop.f32.mrb[0].mxu1 }
 0x24c   :  { %v1436_v40 = vadd.f32 %v1243_v37, %v1138_v39  ;;  %v468_v42 = vpop.f32.mrb[1].mxu1 }
 0x24d   :  { %v1437_v46 = vadd.f32 %v784_v43, %v468_v42 }
 0x24e   :  { %796 = vst.msk [vmem:[#allocation7 + $0x8] sm:$0xff] %vm794_vm2, %v1436_v40  ;;  %v852_v7 = vsel %vm850_vm4, %v1436_v40, 0.0 }
 0x24f   :  { %v851_v4 = vsel %vm849_vm3, %v1437_v46, 0.0  ;;  %795 = vst.msk [vmem:[#allocation7] sm:$0xff] %vm794_vm2, %v1437_v46 }
 0x250   :  { %853 = vadd.xlane.f32.xlu0 %v851_v4 }
 0x254   :  { %855 = vadd.xlane.f32.xlu0 %v852_v7 }
 0x2dd   :  { %v854_v14 = vpop.xlane.xlu0 %853 }
 0x2de   :  { %v866_v55 = vsub.f32 %v807_v52, %v854_v14 }
 0x2e0   :  { %v871_v0 = vsel %vm870_vm5, %v866_v55, 0.0 }
 0x2e1   :  { %v856_v60 = vpop.xlane.xlu0 %855 }
 0x2e2   :  { %v867_v63 = vsub.f32 %v809_v56, %v856_v60 }
 0x2e4   :  { %v872_v1 = vsel %vm870_vm5, %v867_v63, 0.0 }
 0x2e5   :  { %v873_v2 = vadd.f32 %v872_v1, %v871_v0 }
 0x2e7   :  { %874 = vadd.xlane.f32.xlu0 %v873_v2 }
 0x2e8   :  { %1514 = shalt.err (!%p1511_p6)
}
 0x2e9   :  { %s1515_s25 = scalar_lea.hbm %s1961_s4, 256 }
 0x2ea   :  { %p1516_p7 = scmp.ne.s32.totalorder %s1961_s4, %s1515_s25  ;;  %p1519_p8 = scmp.lt.u32.totalorder %s1515_s25, %s1961_s4 }
 0x2ec   :  { %p1521_p9 = pnand %p1519_p8, %p1516_p7 }
 0x2ee   :  { %1524 = shalt.err (!%p1521_p9)
}
 0x2ef   :  { %896 = dma.vmem_to_hbm [thread:$0]  %s891_s21, 256, %s1961_s4, [#allocation4], %s1557_s0, %s1557_s0, %s1558_s16  }
 0x2f0   :  { %s1563_s7 = smov [#allocation8]  }
 0x2f1   :  { %s903_s8 = sshll.u32 %s1563_s7, 4  ;;  %s904_s8 = int_to_ptr.vmem [resolvable:$true] %s903_s8 }
 0x2f2   :  { %s1525_s10 = scalar_lea.vmem %s904_s8, 16  ;;  %s1529_s11 = scalar_lea.vmem %s904_s8, 32 }
 0x2f3   :  { %p1526_p10 = scmp.ne.s32.totalorder %s904_s8, %s1525_s10  ;;  %p1530_p11 = scmp.lt.s32.totalorder %s904_s8, %s904_s8 }
 0x2f4   :  { %p1531_p12 = scmp.lt.s32.totalorder %s1529_s11, %s1525_s10 }
 0x2f6   :  { %p1532_p13 = por %p1531_p12, %p1530_p11 }
 0x2f8   :  { %p1533_p0 = pnand %p1532_p13, %p1526_p10 }
 0x374   :  { %v875_v47 = vpop.xlane.xlu0 %874 }
 0x375   :  { %v876_v5 = vrot.slane %v875_v47, 4 }
 0x377   :  { %v877_v6 = vadd.f32 %v876_v5, %v875_v47 }
 0x379   :  { %v878_v32 = vrot.slane %v877_v6, 2 }
 0x37b   :  { %v879_v33 = vadd.f32 %v878_v32, %v877_v6 }
 0x37d   :  { %v880_v35 = vrot.slane %v879_v33, 1 }
 0x37f   :  { %v881_v41 = vadd.f32 %v880_v35, %v879_v33 }
 0x381   :  { %1446 = vpush %v881_v41 }
 0x3b2   :  { %s1447_s9 = spop %1446 }
 0x3b3   :  { %v883_v21 = vstv %s1447_s9 }
 0x3b4   :  { %884 = vst [vmem:[#allocation8] sm:$0x1] %v883_v21 }
 0x3b5   :  { %1536 = shalt.err (!%p1533_p0)
}
 0x3b6   :  { %s1537_s13 = scalar_lea.hbm %s1962_s5, 16 }
 0x3b7   :  { %p1538_p1 = scmp.ne.s32.totalorder %s1962_s5, %s1537_s13  ;;  %p1541_p2 = scmp.lt.u32.totalorder %s1537_s13, %s1962_s5 }
 0x3b9   :  { %p1543_p3 = pnand %p1541_p2, %p1538_p1 }
 0x3bb   :  { %1546 = shalt.err (!%p1543_p3)
}
 0x3bc   :  { %906 = dma.vmem_to_hbm [thread:$0]  %s904_s8, 16, %s1962_s5, [#allocation9]  }
 0x3bd   :  { %1551 = dma.done.wait [#allocation4], 256  }
 0x3be   :  { %1552 = vsyncadd [#allocation4], 4294967040 }
 0x3bf   :  { %1553 = dma.done.wait [#allocation9], 16  }
 0x3c0   :  { %1554 = vsyncadd [#allocation9], 4294967280 }
 0x3c1   :  { %913 = vsyncpa [#allocation3], 1 }
 0x3c2   :  { %914 = vsyncpa [#allocation6], 1 }
 0x3c3   :  { %915 = vsyncpa [#allocation4], 1 }
 0x3c4   :  { %916 = vsyncpa [#allocation9], 1 }

</bundles_post_ra>
